<compile_context>
chip_gen: v7x
topology: tpu7x:2x2x1
jax: 0.10.0
libtpu: 0.0.40
codegen_flags: <defaults>
</compile_context>

<pallas_src>
import math

import jax
import jax.numpy as jnp
import numpy as np
from jax.experimental import pallas as pl
from jax.experimental.pallas import tpu as pltpu


def _copy_kernel(x_ref, o_ref):
    # Bit-exact pass-through: plain VMEM copy, no arithmetic.
    o_ref[...] = x_ref[...]


def _lane_dense_shape(shape):
    """Collapse an arbitrary shape into a 2-D slab whose last dim is
    lane-dense (a multiple of 128) whenever the element count allows it."""
    total = math.prod(shape)
    if total % 128 == 0:
        return (total // 128, 128)
    return (1, total)  # tiny / odd sizes: single row, still one full block


@jax.jit
def identity(act):
    # NOTE(synk): in a full model, prefer `return act` and let XLA fuse
    # through -- the kernel below exists only because a pallas_call is
    # required for this exercise.
    slab_shape = _lane_dense_shape(act.shape)
    slab = act.reshape(slab_shape)          # free bitcast for contiguous input
    out = pl.pallas_call(
        _copy_kernel,
        out_shape=jax.ShapeDtypeStruct(slab_shape, act.dtype),
        # Whole (tiny) array as a single VMEM-resident block.
        in_specs=[pl.BlockSpec(memory_space=pltpu.MemorySpace.VMEM)],
        out_specs=pl.BlockSpec(memory_space=pltpu.MemorySpace.VMEM),
        # Output aliases the input buffer: no fresh HBM allocation/writeback
        # when the argument is donated.
        input_output_aliases={0: 0},
    )(slab)
    return out.reshape(act.shape)           # free bitcast back to NCHW


if __name__ == "__main__":
    key = jax.random.PRNGKey(0)
    x = jax.random.normal(key, (2, 4, 16, 16), dtype=jnp.float32)  # NCHW
    x_host = np.asarray(x)                  # snapshot for bit-exact comparison

    y = identity(x)
    jax.block_until_ready(y)

    assert y.shape == x_host.shape and y.dtype == jnp.float32
    # Plain copy => bit-exact identity (signed zeros preserved).
    assert np.array_equal(np.asarray(y), x_host)
    print("KERNEL_OK")
</pallas_src>

<mosaic_0001>
module attributes {stable_mosaic.version = 11 : i64} {
  func.func @_copy_kernel(%arg0: memref<16x128xf32, #tpu.memory_space<vmem>>, %arg1: memref<16x128xf32, #tpu.memory_space<vmem>>) attributes {dimension_semantics = [], scalar_prefetch = 0 : i64, scratch_operands = 0 : i64, tpu.core_type = #tpu.core_type<tc>} {
    %c0 = arith.constant 0 : index
    %c0_0 = arith.constant 0 : index
    %0 = vector.load %arg0[%c0, %c0_0] : memref<16x128xf32, #tpu.memory_space<vmem>>, vector<16x128xf32>
    %c0_1 = arith.constant 0 : index
    %c0_2 = arith.constant 0 : index
    %1 = vector.load %arg1[%c0_1, %c0_2] : memref<16x128xf32, #tpu.memory_space<vmem>>, vector<16x128xf32>
    tpu.vector_store %arg1[%c0_1, %c0_2], %0 {strides = array<i32>} : memref<16x128xf32, #tpu.memory_space<vmem>>, vector<16x128xf32>,
    return
  }
}

</mosaic_0001>

<bundles_post_ra>
// kernel: identity.1
= control target key start
LH: loop header
LB: loop body
LE: loop exit
PB: predicated region body
PF: predicated region fallthrough
CT: control target
= control target key end

     0   :  { %s38_s0 = inlined_call_operand.vmem [shape: f32[16,128], index: 0, kind: input, shape index: {}, may-alias: {0,1}]   ;;  %s39_s1 = inlined_call_operand.vmem [shape: f32[16,128], index: 1, kind: output, shape index: {}, may-alias: {0,1}]  }
   0x1   :  { %v8_v0 = vld [vmem:[%s38_s0] sm:$0xff]  ;;  %v9_v1 = vld [vmem:[%s38_s0 + $0x8] sm:$0xff] }
   0x2   :  { %10 = vst [vmem:[%s39_s1] sm:$0xff] %v8_v0  ;;  %11 = vst [vmem:[%s39_s1 + $0x8] sm:$0xff] %v9_v1 }

</bundles_post_ra>
